<compile_context>
chip_gen: v7x
topology: tpu7x:2x2x1
jax: 0.10.0
libtpu: 0.0.40
codegen_flags: <defaults>
</compile_context>

<pallas_src>
import jax
import jax.numpy as jnp
from jax.experimental import pallas as pl
from jax.experimental.pallas import tpu as pltpu


def transition_kernel(x_ref, w_ref, b_ref, o_ref, acc_ref):
    """One row tile of fused conv(1x3, pad=1) + maxpool((2,1), stride=2).

    x_ref  : (TM, Wk*Cin)       padded-input rows (TM even), bf16/f32
    w_ref  : (Wk*Cin, Wp*Cout)  conv taps scattered onto even output columns
    b_ref  : (1, Wp*Cout)       bias tiled over output columns, f32
    o_ref  : (TM//2, Wp*Cout)   pooled output rows, f32
    acc_ref: (TM, Wp*Cout)      f32 VMEM scratch holding the conv rows
    """
    # Single fused MXU matmul (all 3 taps, all pooled output columns), f32 acc.
    acc_ref[...] = (
        jnp.dot(x_ref[...], w_ref[...], preferred_element_type=jnp.float32)
        + b_ref[...]
    )
    # MaxPool2d((2,1), stride=2) along H == pairwise max of consecutive conv
    # rows: two strided row reads + one lane-dense block store.
    half = o_ref.shape[0]
    even = acc_ref[pl.ds(0, half, stride=2), :]   # conv rows 0, 2, 4, ...
    odd = acc_ref[pl.ds(1, half, stride=2), :]    # conv rows 1, 3, 5, ...
    o_ref[...] = jnp.maximum(even, odd).astype(o_ref.dtype)


def _pick_row_tile(m):
    """Largest even, 16-aligned row tile dividing m (whole thing when small)."""
    if m <= 1024:
        return m
    for tm in (1024, 512, 256, 128, 64, 32, 16):
        if m % tm == 0:
            return tm
    return m


def transition_layer(x, weight, bias, *, compute_dtype=jnp.bfloat16):
    """TransitionLayer forward.

    x: (N, Cin, H, W) NCHW; weight: (Cout, Cin, 1, 3); bias: (Cout,).
    Returns (N, Cout, H//2 + 1, (W-1)//2 + 1) in f32 (NCHW).
    """
    N, Cin, H, W = x.shape
    Cout = weight.shape[0]
    assert H % 2 == 0 and H >= 2, "kernel assumes even H"
    Hp = H // 2 + 1            # conv H_out = H+2 (pad=1, kh=1); pool (2,), s=2
    Wp = (W - 1) // 2 + 1      # conv W_out = W; pool (1,), stride 2
    Wk = 2 * Wp + 1            # padded-W columns actually consumed
    K = Wk * Cin               # matmul contraction dim (lane-dense)
    NC = Wp * Cout             # matmul / output lane dim (lane-dense)
    M = N * (H + 2)            # conv rows, batch flattened in (even)

    # ---- wrapper glue (one fused XLA pass over the activations) -----------
    # NCHW -> NHWC, zero-pad H by 1 each side (those conv rows are pure bias)
    # and W to exactly Wk columns, flatten to (rows, Wk*Cin), cast for the MXU.
    x_nhwc = jnp.transpose(x, (0, 2, 3, 1))
    xp = jnp.pad(x_nhwc, ((0, 0), (1, 1), (1, Wk - 1 - W), (0, 0)))
    x2d = xp.reshape(M, K).astype(compute_dtype)

    # ---- fold the 3 taps + the pool's stride-2 column selection into one
    # weight:  w_big[(2s+k)*Cin + c, s*Cout + o] = weight[o, c, 0, k]
    wt = jnp.transpose(weight[:, :, 0, :], (2, 1, 0)).astype(jnp.float32)  # (3,Cin,Cout)
    cols = jnp.arange(Wk)[:, None, None]
    sidx = jnp.arange(Wp)[None, :, None]
    taps = jnp.arange(3)[None, None, :]
    sel = (cols == 2 * sidx + taps).astype(jnp.float32)                    # (Wk,Wp,3)
    w_big = (jnp.einsum("wsk,kco->wcso", sel, wt)
             .reshape(K, NC).astype(compute_dtype))
    b_big = jnp.tile(bias.astype(jnp.float32), Wp).reshape(1, NC)

    TM = _pick_row_tile(M)
    grid = (M // TM,)
    itemsize = jnp.dtype(compute_dtype).itemsize

    out2d = pl.pallas_call(
        transition_kernel,
        out_shape=jax.ShapeDtypeStruct((M // 2, NC), jnp.float32),
        grid=grid,
        in_specs=[
            pl.BlockSpec((TM, K), lambda i: (i, 0)),
            pl.BlockSpec((K, NC), lambda i: (0, 0)),
            pl.BlockSpec((1, NC), lambda i: (0, 0)),
        ],
        out_specs=pl.BlockSpec((TM // 2, NC), lambda i: (i, 0)),
        scratch_shapes=[pltpu.VMEM((TM, NC), jnp.float32)],
        compiler_params=pltpu.CompilerParams(
            dimension_semantics=("parallel",)),
        cost_estimate=pl.CostEstimate(
            flops=2 * M * K * NC,
            transcendentals=0,
            bytes_accessed=(M * K + K * NC) * itemsize + NC * 4 + (M // 2) * NC * 4,
        ),
    )(x2d, w_big, b_big)

    # (N*Hp, Wp*Cout) -> (N, Cout, Hp, Wp)
    return out2d.reshape(N, Hp, Wp, Cout).transpose(0, 3, 1, 2)


def reference(x, weight, bias, *, compute_dtype=jnp.bfloat16):
    """Plain-XLA TransitionLayer using the same input precision as the kernel."""
    conv = jax.lax.conv_general_dilated(
        x.astype(compute_dtype), weight.astype(compute_dtype),
        window_strides=(1, 1), padding=((1, 1), (1, 1)),
        dimension_numbers=("NCHW", "OIHW", "NCHW"),
        preferred_element_type=jnp.float32,
    ) + bias[None, :, None, None].astype(jnp.float32)
    pooled = jax.lax.reduce_window(
        conv, -jnp.inf, jax.lax.max,
        window_dimensions=(1, 1, 2, 1), window_strides=(1, 1, 2, 2),
        padding="VALID",
    )
    return pooled


if __name__ == "__main__":
    key = jax.random.PRNGKey(0)
    k1, k2, k3 = jax.random.split(key, 3)

    N, Cin, Cout, H, W = 2, 8, 16, 16, 16
    x = jax.random.normal(k1, (N, Cin, H, W), dtype=jnp.float32)
    # Deterministic synthetic Conv2d(Cin, Cout, (1,3)) parameters.
    weight = jax.random.normal(k2, (Cout, Cin, 1, 3), dtype=jnp.float32) * 0.1
    bias = jax.random.normal(k3, (Cout,), dtype=jnp.float32) * 0.1

    out = jax.block_until_ready(transition_layer(x, weight, bias))
    ref = jax.block_until_ready(reference(x, weight, bias))

    expected_shape = (N, Cout, H // 2 + 1, (W - 1) // 2 + 1)
    assert out.shape == ref.shape == expected_shape, (out.shape, ref.shape)
    err = float(jnp.max(jnp.abs(out - ref)))
    assert err < 2e-2, err
    print("KERNEL_OK")
</pallas_src>

<mosaic_0001>
module attributes {stable_mosaic.version = 11 : i64} {
  func.func @transition_kernel(%arg0: i32, %arg1: memref<36x136xbf16, #tpu.memory_space<vmem>>, %arg2: memref<136x128xbf16, #tpu.memory_space<vmem>>, %arg3: memref<1x128xf32, #tpu.memory_space<vmem>>, %arg4: memref<18x128xf32, #tpu.memory_space<vmem>>, %arg5: memref<36x128xf32, #tpu.memory_space<vmem>>) attributes {dimension_semantics = [#tpu.dimension_semantics<parallel>], iteration_bounds = array<i64: 1>, scalar_prefetch = 0 : i64, scratch_operands = 1 : i64, tpu.core_type = #tpu.core_type<tc>, window_params = [{transform_indices = @transform_0, window_bounds = array<i64: 36, 136>}, {pipeline_mode = #tpu.pipeline_mode<synchronous>, transform_indices = @transform_1, window_bounds = array<i64: 136, 128>}, {pipeline_mode = #tpu.pipeline_mode<synchronous>, transform_indices = @transform_2, window_bounds = array<i64: 1, 128>}, {transform_indices = @transform_3, window_bounds = array<i64: 18, 128>}]} {
    %c0 = arith.constant 0 : index
    %c0_0 = arith.constant 0 : index
    %0 = vector.load %arg1[%c0, %c0_0] : memref<36x136xbf16, #tpu.memory_space<vmem>>, vector<36x136xbf16>
    %c0_1 = arith.constant 0 : index
    %c0_2 = arith.constant 0 : index
    %1 = vector.load %arg2[%c0_1, %c0_2] : memref<136x128xbf16, #tpu.memory_space<vmem>>, vector<136x128xbf16>
    %cst = arith.constant dense<0.000000e+00> : vector<36x128xf32>
    %2 = tpu.matmul %0, %1, %cst {dimension_numbers = #tpu.dot_dimension_numbers<[1], [0], [0], [1], [0, 0, 1, 1], [], []>} : vector<36x136xbf16>, vector<136x128xbf16>, vector<36x128xf32> -> vector<36x128xf32>
    %c0_3 = arith.constant 0 : index
    %c0_4 = arith.constant 0 : index
    %3 = vector.load %arg3[%c0_3, %c0_4] : memref<1x128xf32, #tpu.memory_space<vmem>>, vector<1x128xf32>
    %4 = vector.broadcast %3 : vector<1x128xf32> to vector<36x128xf32>
    %5 = arith.addf %2, %4 : vector<36x128xf32>
    %c0_5 = arith.constant 0 : index
    %c0_6 = arith.constant 0 : index
    %6 = vector.load %arg5[%c0_5, %c0_6] : memref<36x128xf32, #tpu.memory_space<vmem>>, vector<36x128xf32>
    tpu.vector_store %arg5[%c0_5, %c0_6], %5 {strides = array<i32>} : memref<36x128xf32, #tpu.memory_space<vmem>>, vector<36x128xf32>,
    %c0_7 = arith.constant 0 : index
    %c0_8 = arith.constant 0 : index
    %7 = tpu.strided_load %arg5[%c0_7, %c0_8] {strides = array<i32: 2, 1>} : memref<36x128xf32, #tpu.memory_space<vmem>>, vector<18x128xf32>
    %c1 = arith.constant 1 : index
    %c0_9 = arith.constant 0 : index
    %8 = tpu.strided_load %arg5[%c1, %c0_9] {strides = array<i32: 2, 1>} : memref<36x128xf32, #tpu.memory_space<vmem>>, vector<18x128xf32>
    %9 = arith.maximumf %7, %8 : vector<18x128xf32>
    %c0_10 = arith.constant 0 : index
    %c0_11 = arith.constant 0 : index
    %10 = vector.load %arg4[%c0_10, %c0_11] : memref<18x128xf32, #tpu.memory_space<vmem>>, vector<18x128xf32>
    tpu.vector_store %arg4[%c0_10, %c0_11], %9 {strides = array<i32>} : memref<18x128xf32, #tpu.memory_space<vmem>>, vector<18x128xf32>,
    return
  }
  func.func @transform_0(%arg0: i32) -> (i32, i32) {
    %c0_i32 = arith.constant 0 : i32
    %c0_i32_0 = arith.constant 0 : i32
    return %arg0, %c0_i32 : i32, i32
  }
  func.func @transform_1(%arg0: i32) -> (i32, i32) {
    %c0_i32 = arith.constant 0 : i32
    %c0_i32_0 = arith.constant 0 : i32
    %c0_i32_1 = arith.constant 0 : i32
    return %c0_i32, %c0_i32_0 : i32, i32
  }
  func.func @transform_2(%arg0: i32) -> (i32, i32) {
    %c0_i32 = arith.constant 0 : i32
    %c0_i32_0 = arith.constant 0 : i32
    %c0_i32_1 = arith.constant 0 : i32
    return %c0_i32, %c0_i32_0 : i32, i32
  }
  func.func @transform_3(%arg0: i32) -> (i32, i32) {
    %c0_i32 = arith.constant 0 : i32
    %c0_i32_0 = arith.constant 0 : i32
    return %arg0, %c0_i32 : i32, i32
  }
}

</mosaic_0001>

<bundles_post_ra>
// kernel: tpu_custom_call.1
= control target key start
LH: loop header
LB: loop body
LE: loop exit
PB: predicated region body
PF: predicated region fallthrough
CT: control target
= control target key end

     0   :  { %8 = vsyncpa [#allocation4], 0  ;;  %s468_s0 = inlined_call_operand.hbm [shape: bf16[36,136], index: 0, kind: input, shape index: {}]   ;;  %s469_s1 = inlined_call_operand.hbm [shape: bf16[136,128], index: 1, kind: input, shape index: {}]   ;;  %s470_s2 = inlined_call_operand.vmem [shape: f32[1,128], index: 2, kind: input, shape index: {}]   ;;  %s471_s3 = inlined_call_operand.hbm [shape: f32[18,128], index: 3, kind: output, shape index: {}]  }
   0x1   :  { %9 = vsyncpa [#allocation7], 0 }
   0x2   :  { %10 = vsyncpa [#allocation5], 0  ;;  %s392_s12 = smov [#allocation3]   ;;  %s320_s16 = scalar_lea.hbm %s468_s0, 640 }
   0x3   :  { %s16_s13 = sshll.u32 %s392_s12, 4  ;;  %p321_p0 = scmp.ne.s32.totalorder %s468_s0, %s320_s16  ;;  %s17_s13 = int_to_ptr.vmem [resolvable:$true] %s16_s13 }
   0x4   :  { %p324_p1 = scmp.lt.u32.totalorder %s320_s16, %s468_s0 }
   0x6   :  { %p326_p2 = pnand %p324_p1, %p321_p0 }
   0x8   :  { %329 = shalt.err (!%p326_p2)
}
   0x9   :  { %s330_s21 = scalar_lea.vmem %s17_s13, 640  ;;  %p335_p4 = scmp.lt.s32.totalorder %s17_s13, %s17_s13 }
   0xa   :  { %p331_p3 = scmp.ne.s32.totalorder %s17_s13, %s330_s21  ;;  %p336_p5 = scmp.lt.s32.totalorder %s330_s21, %s330_s21 }
   0xc   :  { %p337_p6 = por %p336_p5, %p335_p4 }
   0xe   :  { %p338_p7 = pnand %p337_p6, %p331_p3 }
  0x10   :  { %341 = shalt.err (!%p338_p7)
}
  0x11   :  { %s393_s22 = smov 128   ;;  %s394_s23 = smov 8  }
  0x12   :  { %22 = dma.hbm_to_vmem [thread:$0]  %s468_s0, 640, %s17_s13, [#allocation4], %s393_s22, %s393_s22, %s394_s23  }
  0x13   :  { %s395_s26 = smov [#allocation6]   ;;  %s342_s30 = scalar_lea.hbm %s469_s1, 1088 }
  0x14   :  { %s28_s27 = sshll.u32 %s395_s26, 4  ;;  %p343_p8 = scmp.ne.s32.totalorder %s469_s1, %s342_s30  ;;  %s29_s27 = int_to_ptr.vmem [resolvable:$true] %s28_s27 }
  0x15   :  { %p346_p9 = scmp.lt.u32.totalorder %s342_s30, %s469_s1 }
  0x17   :  { %p348_p10 = pnand %p346_p9, %p343_p8 }
  0x19   :  { %351 = shalt.err (!%p348_p10)
}
  0x1a   :  { %s352_s8 = scalar_lea.vmem %s29_s27, 1088  ;;  %p357_p12 = scmp.lt.s32.totalorder %s29_s27, %s29_s27 }
  0x1b   :  { %p353_p11 = scmp.ne.s32.totalorder %s29_s27, %s352_s8  ;;  %p358_p13 = scmp.lt.s32.totalorder %s352_s8, %s352_s8 }
  0x1d   :  { %p359_p0 = por %p358_p13, %p357_p12 }
  0x1f   :  { %p360_p1 = pnand %p359_p0, %p353_p11 }
  0x21   :  { %363 = shalt.err (!%p360_p1)
}
  0x22   :  { %s396_s0 = smov 64   ;;  %s397_s9 = smov 4  }
  0x23   :  { %34 = dma.hbm_to_vmem [thread:$0]  %s469_s1, 1088, %s29_s27, [#allocation7], %s396_s0, %s396_s0, %s397_s9  }
  0x24   :  { %386 = dma.done.wait [#allocation4], 640  }
  0x25   :  { %387 = vsyncadd [#allocation4], 4294966656 }
  0x26   :  { %388 = dma.done.wait [#allocation7], 1088  }
  0x27   :  { %389 = vsyncadd [#allocation7], 4294966208  ;;  %v398_v0 = vmov 0   ;;  %v303_v1 = vld [vmem:[#allocation6] sm:$0xff]   ;;  %v304_v2 = vld [vmem:[#allocation6 + $0x8] sm:$0xff]   ;;  %vm148_vm0 = vcmask 64512  }
  0x28   :  { %277 = vmatprep.subr.bf16.mxu1 %v398_v0  ;;  %162 = vmatprep.subr.bf16.mxu0 %v398_v0  ;;  %v305_v3 = vld [vmem:[#allocation6 + $0x10] sm:$0xff]   ;;  %v306_v5 = vld [vmem:[#allocation6 + $0x18] sm:$0xff]   ;;  %v307_v7 = vld [vmem:[#allocation6 + $0x20] sm:$0xff]   ;;  %vm158_vm1 = vcmask 1043456  }
  0x29   :  { %286 = vmatpush1.bf16.msra.mxu1 %v303_v1  ;;  %163 = vmatpush1.bf16.msra.mxu0 %v303_v1  ;;  %v314_v4 = vld [vmem:[#allocation3 + $0x14] ss:$8 sps:$4 sm:$0xff]   ;;  %v317_v6 = vld [vmem:[#allocation3 + $0x4] ss:$8 sps:$4 sm:$0xff]   ;;  %v311_v11 = vld [vmem:[#allocation6 + $0x40] ss:$0 sps:$4 sm:$0xff]  }
  0x2a   :  { %278 = vmatprep.subr.bf16.mxu1 %v398_v0  ;;  %164 = vmatprep.subr.bf16.mxu0 %v398_v0  ;;  %v308_v8 = vld [vmem:[#allocation6 + $0x28] sm:$0xff]   ;;  %v309_v9 = vld [vmem:[#allocation6 + $0x30] sm:$0xff]   ;;  %v310_v10 = vld [vmem:[#allocation6 + $0x38] sm:$0xff]   ;;  %v160_v12 = vsel %vm158_vm1, %v311_v11, 0 }
  0x2b   :  { %275 = vmatprep.mubr.msk.bf16.mxu1 %vm148_vm0, %v314_v4  ;;  %274 = vmatprep.mubr.msk.bf16.mxu0 %vm148_vm0, %v317_v6  ;;  %v48_v13 = vld [vmem:[#allocation3 + $0x20] sm:$0x33]  ;;  %v312_v14 = vld [vmem:[#allocation3 + $0x10] ss:$8 sps:$4 sm:$0xff]  }
  0x2c   :  { %v315_v15 = vld [vmem:[#allocation3] ss:$8 sps:$4 sm:$0xff]   ;;  %v264_v16 = vcombine.high %v48_v13, %v48_v13  ;;  %v263_v17 = vcombine.low %v48_v13, %v48_v13  ;;  %v258_v18 = vld [vmem:[%s470_s2] ss:$0 sm:$0xff]  ;;  %s399_s2 = smov [#allocation8]  }
  0x2d   :  { %287 = vmatpush1.bf16.msra.mxu1 %v304_v2  ;;  %165 = vmatpush1.bf16.msra.mxu0 %v304_v2  ;;  %s245_s13 = sshll.u32 %s399_s2, 4  ;;  %s246_s13 = int_to_ptr.vmem [resolvable:$true] %s245_s13 }
  0x2e   :  { %279 = vmatprep.subr.bf16.mxu1 %v398_v0  ;;  %166 = vmatprep.subr.bf16.mxu0 %v398_v0  ;;  %s364_s14 = scalar_lea.vmem %s246_s13, 384  ;;  %p369_p3 = scmp.lt.s32.totalorder %s246_s13, %s246_s13 }
  0x2f   :  { %p365_p2 = scmp.ne.s32.totalorder %s246_s13, %s364_s14  ;;  %p370_p4 = scmp.lt.s32.totalorder %s364_s14, %s364_s14 }
  0x31   :  { %288 = vmatpush1.bf16.msra.mxu1 %v305_v3  ;;  %167 = vmatpush1.bf16.msra.mxu0 %v305_v3  ;;  %p371_p5 = por %p370_p4, %p369_p3 }
  0x32   :  { %280 = vmatprep.subr.bf16.mxu1 %v398_v0  ;;  %168 = vmatprep.subr.bf16.mxu0 %v398_v0 }
  0x33   :  { %p372_p6 = pnand %p371_p5, %p365_p2 }
  0x35   :  { %289 = vmatpush1.bf16.msra.mxu1 %v306_v5  ;;  %169 = vmatpush1.bf16.msra.mxu0 %v306_v5 }
  0x36   :  { %281 = vmatprep.subr.bf16.mxu1 %v398_v0  ;;  %170 = vmatprep.subr.bf16.mxu0 %v398_v0 }
  0x39   :  { %290 = vmatpush1.bf16.msra.mxu1 %v307_v7  ;;  %171 = vmatpush1.bf16.msra.mxu0 %v307_v7 }
  0x3a   :  { %282 = vmatprep.subr.bf16.mxu1 %v398_v0  ;;  %172 = vmatprep.subr.bf16.mxu0 %v398_v0 }
  0x3d   :  { %291 = vmatpush1.bf16.msra.mxu1 %v308_v8  ;;  %173 = vmatpush1.bf16.msra.mxu0 %v308_v8 }
  0x3e   :  { %283 = vmatprep.subr.bf16.mxu1 %v398_v0  ;;  %174 = vmatprep.subr.bf16.mxu0 %v398_v0 }
  0x41   :  { %292 = vmatpush1.bf16.msra.mxu1 %v309_v9  ;;  %175 = vmatpush1.bf16.msra.mxu0 %v309_v9 }
  0x42   :  { %284 = vmatprep.subr.bf16.mxu1 %v398_v0  ;;  %176 = vmatprep.subr.bf16.mxu0 %v398_v0 }
  0x45   :  { %293 = vmatpush1.bf16.msra.mxu1 %v310_v10  ;;  %177 = vmatpush1.bf16.msra.mxu0 %v310_v10 }
  0x46   :  { %285 = vmatprep.subr.bf16.mxu1 %v398_v0  ;;  %178 = vmatprep.subr.bf16.mxu0 %v398_v0 }
  0x49   :  { %294 = vmatpush1.bf16.msra.mxu1 %v160_v12  ;;  %179 = vmatpush1.bf16.msra.mxu0 %v160_v12 }
  0x4c   :  { %203 = vmatmul.mubr.bf16.vlgmr.msra.gmra.mrb[0].mxu1 %v312_v14  ;;  %195 = vmatmul.mubr.bf16.vlgmr.msra.gmra.mrb[0].mxu0 %v315_v15 }
  0x4d   :  { %276 = vmatprep.mubr.msk.bf16.mxu1 %vm148_vm0, %v264_v16 }
  0x54   :  { %211 = vmatmul.mubr.bf16.gmra.mrb[4].mxu1 %v263_v17 }
 0x11f   :  { %v204_v19 = vpop.f32.mrb[0].mxu1  ;;  %v196_v20 = vpop.f32.mrb[0].mxu0 }
 0x120   :  { %v205_v21 = vadd.f32 %v258_v18, %v204_v19  ;;  %v206_v22 = vpop.f32.mrb[1].mxu1  ;;  %v197_v23 = vadd.f32 %v258_v18, %v196_v20  ;;  %v198_v24 = vpop.f32.mrb[1].mxu0 }
 0x121   :  { %v207_v25 = vpop.f32.mrb[2].mxu1  ;;  %v199_v26 = vpop.f32.mrb[2].mxu0 }
 0x122   :  { %220 = vst [vmem:[#allocation2 + $0x10] sm:$0xff] %v205_v21  ;;  %v208_v27 = vadd.f32 %v258_v18, %v207_v25  ;;  %218 = vst [vmem:[#allocation2] sm:$0xff] %v197_v23  ;;  %v209_v28 = vpop.f32.mrb[3].mxu1  ;;  %v200_v29 = vadd.f32 %v258_v18, %v199_v26  ;;  %v201_v30 = vpop.f32.mrb[3].mxu0 }
 0x124   :  { %221 = vst [vmem:[#allocation2 + $0x18] sm:$0xff] %v208_v27  ;;  %219 = vst [vmem:[#allocation2 + $0x8] sm:$0xff] %v200_v29 }
 0x127   :  { %v212_v31 = vpop.f32.mrb[4].mxu1 }
 0x128   :  { %v213_v32 = vadd.f32 %v258_v18, %v212_v31  ;;  %v214_v33 = vpop.f32.mrb[5].mxu1 }
 0x129   :  { %v215_v34 = vpop.f32.mrb[6].mxu1 }
 0x12a   :  { %222 = vst [vmem:[#allocation2 + $0x20] sm:$0xf] %v213_v32  ;;  %v216_v35 = vpop.f32.mrb[7].mxu1 }
 0x12b   :  { %v223_v36 = vld [vmem:[#allocation2] ss:$2 sm:$0xff]  ;;  %v225_v37 = vld [vmem:[#allocation2 + $0x10] ss:$2 sm:$0xff]  ;;  %v229_v38 = vld [vmem:[#allocation2 + $0x1] ss:$2 sm:$0xff] }
 0x12c   :  { %v231_v39 = vld [vmem:[#allocation2 + $0x11] ss:$2 sm:$0xff]  ;;  %v234_v40 = vmax.f32 %v223_v36, %v229_v38 }
 0x12d   :  { %v235_v41 = vmax.f32 %v225_v37, %v231_v39 }
 0x12e   :  { %237 = vst [vmem:[#allocation8] sm:$0xff] %v234_v40 }
 0x12f   :  { %238 = vst [vmem:[#allocation8 + $0x8] sm:$0xff] %v235_v41 }
 0x131   :  { %v227_v42 = vld [vmem:[#allocation2 + $0x20] ss:$2 sm:$0x3]  ;;  %v233_v43 = vld [vmem:[#allocation2 + $0x21] ss:$2 sm:$0x3] }
 0x132   :  { %v236_v44 = vmax.f32 %v227_v42, %v233_v43 }
 0x134   :  { %239 = vst [vmem:[#allocation8 + $0x10] sm:$0x3] %v236_v44 }
 0x135   :  { %375 = shalt.err (!%p372_p6)
}
 0x136   :  { %s376_s17 = scalar_lea.hbm %s471_s3, 384 }
 0x137   :  { %p377_p7 = scmp.ne.s32.totalorder %s471_s3, %s376_s17  ;;  %p380_p8 = scmp.lt.u32.totalorder %s376_s17, %s471_s3 }
 0x139   :  { %p382_p9 = pnand %p380_p8, %p377_p7 }
 0x13b   :  { %385 = shalt.err (!%p382_p9)
}
 0x13c   :  { %251 = dma.vmem_to_hbm [thread:$0]  %s246_s13, 384, %s471_s3, [#allocation5], %s393_s22, %s393_s22, %s394_s23  }
 0x13d   :  { %390 = dma.done.wait [#allocation5], 384  }
 0x13e   :  { %391 = vsyncadd [#allocation5], 4294966912 }
 0x13f   :  { %255 = vsyncpa [#allocation4], 1 }
 0x140   :  { %256 = vsyncpa [#allocation7], 1 }
 0x141   :  { %257 = vsyncpa [#allocation5], 1 }

</bundles_post_ra>
